<compile_context>
chip_gen: v5e
topology: v5e:2x2
jax: 0.10.0
libtpu: 0.0.40
codegen_flags: <defaults>
</compile_context>

<pallas_src>
import math

import jax
import jax.numpy as jnp
from jax import lax
from jax.experimental import pallas as pl
from jax.experimental.pallas import tpu as pltpu

HIDDEN = 24
LANE_PAD = 128  # lane stride for the padded Q/K/V column groups


def _make_kernel(H, HP):
    def kernel(x_ref, pos_ref, wqkv_ref, bqkv_ref, mask_ref, o_ref):
        # x_ref:    (BS, H)       flattened activations
        # pos_ref:  (BS, H)       posi_emb, pre-broadcast in the wrapper
        # wqkv_ref: (H, 3*HP)     [Wq*scale | pad | Wk | pad | Wv | pad]
        # bqkv_ref: (BS, 3*HP)    matching biases, pre-broadcast
        # mask_ref: (BS, BS)      block-diagonal bias: 0 in-batch, -1e30 across
        # o_ref:    (BS, H)
        x = x_ref[...] + pos_ref[...]                       # clinical_emb + posi_emb

        # Fused Q/K/V projection: one (BS, H) x (H, 3*HP) MXU matmul.
        qkv = jnp.dot(x, wqkv_ref[...],
                      preferred_element_type=jnp.float32) + bqkv_ref[...]
        q = qkv[:, 0:H]                      # lane offset 0   -> free vreg pick
        k = qkv[:, HP:HP + H]                # lane offset 128 -> free vreg pick
        v = qkv[:, 2 * HP:2 * HP + H]        # lane offset 256 -> free vreg pick

        # Single (BS, BS) score matmul (contract last dims of q and k) plus the
        # block-diagonal bias; softmax runs over all 16 lanes but cross-batch
        # entries underflow to exactly 0 after exp.
        s = lax.dot_general(q, k, (((1,), (1,)), ((), ())),
                            preferred_element_type=jnp.float32)
        s = s + mask_ref[...]
        s = s - jnp.max(s, axis=-1, keepdims=True)
        p = jnp.exp(s)
        denom = jnp.sum(p, axis=-1, keepdims=True)
        r = pl.reciprocal(denom, approx=True)   # EUP vrcp (otherwise idle slot)
        r = r * (2.0 - denom * r)               # one Newton step -> ~f32 accuracy
        p = p * r

        # Single (BS, BS) x (BS, H) matmul; residual against pos-augmented input.
        attn = jnp.dot(p, v, preferred_element_type=jnp.float32)
        o_ref[...] = (attn + x).astype(o_ref.dtype)

    return kernel


def attention_forward(x, posi_emb, wq, bq, wk, bk, wv, bv):
    """x: (B, S, H) f32; posi_emb: (1, 1, H); w*: (H, H) PyTorch (out,in); b*: (H,)."""
    B, S, H = x.shape
    BS = B * S
    HP = LANE_PAD
    scale = 1.0 / math.sqrt(H)

    # Fused, lane-padded QKV weight (in, out) with 1/sqrt(H) folded into Wq/bq.
    wqkv = jnp.zeros((H, 3 * HP), jnp.float32)
    wqkv = wqkv.at[:, 0:H].set((wq * scale).T)
    wqkv = wqkv.at[:, HP:HP + H].set(wk.T)
    wqkv = wqkv.at[:, 2 * HP:2 * HP + H].set(wv.T)

    bqkv_row = jnp.zeros((3 * HP,), jnp.float32)
    bqkv_row = bqkv_row.at[0:H].set(bq * scale)
    bqkv_row = bqkv_row.at[HP:HP + H].set(bk)
    bqkv_row = bqkv_row.at[2 * HP:2 * HP + H].set(bv)
    bqkv = jnp.broadcast_to(bqkv_row[None, :], (BS, 3 * HP))

    pos = jnp.broadcast_to(posi_emb.reshape(1, H), (BS, H))

    # Block-diagonal attention bias: 0 within a batch element, -1e30 across.
    bidx = jnp.arange(BS, dtype=jnp.int32) // S
    attn_bias = jnp.where(bidx[:, None] == bidx[None, :], 0.0,
                          -1e30).astype(jnp.float32)

    x2d = x.reshape(BS, H)

    flops = 2 * BS * H * (3 * HP) + 2 * BS * H * BS + 2 * BS * BS * H
    bytes_accessed = 4 * (x2d.size + pos.size + wqkv.size + bqkv.size
                          + attn_bias.size + BS * H)

    out2d = pl.pallas_call(
        _make_kernel(H, HP),
        out_shape=jax.ShapeDtypeStruct((BS, H), x.dtype),
        grid_spec=pltpu.PrefetchScalarGridSpec(
            num_scalar_prefetch=0,
            grid=(1,),                                        # whole problem in one step
            in_specs=[
                pl.BlockSpec((BS, H), lambda i: (0, 0)),       # x (flattened)
                pl.BlockSpec((BS, H), lambda i: (0, 0)),       # posi_emb (broadcast)
                pl.BlockSpec((H, 3 * HP), lambda i: (0, 0)),   # fused/padded Wqkv
                pl.BlockSpec((BS, 3 * HP), lambda i: (0, 0)),  # fused/padded bqkv
                pl.BlockSpec((BS, BS), lambda i: (0, 0)),      # block-diag attn bias
            ],
            out_specs=pl.BlockSpec((BS, H), lambda i: (0, 0)),
        ),
        compiler_params=pltpu.CompilerParams(
            dimension_semantics=("parallel",)),                # shards across TCs if stacked
        cost_estimate=pl.CostEstimate(flops=flops,
                                      transcendentals=BS * BS + BS,
                                      bytes_accessed=bytes_accessed),
    )(x2d, pos, wqkv, bqkv, attn_bias)

    return out2d.reshape(B, S, H)


def _reference(x, posi_emb, wq, bq, wk, bk, wv, bv):
    x = x + posi_emb
    q = x @ wq.T + bq
    k = x @ wk.T + bk
    v = x @ wv.T + bv
    s = jax.nn.softmax((q @ jnp.swapaxes(k, 1, 2)) / math.sqrt(HIDDEN), axis=-1)
    return s @ v + x


if __name__ == "__main__":
    key = jax.random.PRNGKey(0)
    B, S, H = 2, 8, HIDDEN
    k_x, k_wq, k_bq, k_wk, k_bk, k_wv, k_bv = jax.random.split(key, 7)

    x = jax.random.normal(k_x, (B, S, H), dtype=jnp.float32)

    # Deterministic parameter init (PyTorch Linear default: U(-1/sqrt(H), 1/sqrt(H)))
    bound = 1.0 / math.sqrt(H)
    init = lambda k, shape: jax.random.uniform(
        k, shape, dtype=jnp.float32, minval=-bound, maxval=bound)
    wq, bq = init(k_wq, (H, H)), init(k_bq, (H,))
    wk, bk = init(k_wk, (H, H)), init(k_bk, (H,))
    wv, bv = init(k_wv, (H, H)), init(k_bv, (H,))
    posi_emb = jnp.zeros((1, 1, H), dtype=jnp.float32)  # nn.Parameter(torch.zeros(...))

    out = attention_forward(x, posi_emb, wq, bq, wk, bk, wv, bv)
    out = jax.block_until_ready(out)

    ref = _reference(x, posi_emb, wq, bq, wk, bk, wv, bv)
    assert out.shape == (B, S, H)
    # approx reciprocal + Newton step keeps error far below this tolerance.
    assert jnp.allclose(out, ref, atol=1e-3, rtol=1e-3), \
        f"max err {jnp.max(jnp.abs(out - ref))}"
    print("KERNEL_OK")
</pallas_src>

<mosaic_0001>
module attributes {stable_mosaic.version = 11 : i64} {
  func.func @kernel(%arg0: i32, %arg1: memref<16x24xf32, #tpu.memory_space<vmem>>, %arg2: memref<16x24xf32, #tpu.memory_space<vmem>>, %arg3: memref<24x384xf32, #tpu.memory_space<vmem>>, %arg4: memref<16x384xf32, #tpu.memory_space<vmem>>, %arg5: memref<16x16xf32, #tpu.memory_space<vmem>>, %arg6: memref<16x24xf32, #tpu.memory_space<vmem>>) attributes {dimension_semantics = [#tpu.dimension_semantics<parallel>], iteration_bounds = array<i64: 1>, scalar_prefetch = 0 : i64, scratch_operands = 0 : i64, tpu.core_type = #tpu.core_type<tc>, window_params = [{pipeline_mode = #tpu.pipeline_mode<synchronous>, transform_indices = @transform_0, window_bounds = array<i64: 16, 24>}, {pipeline_mode = #tpu.pipeline_mode<synchronous>, transform_indices = @transform_1, window_bounds = array<i64: 16, 24>}, {pipeline_mode = #tpu.pipeline_mode<synchronous>, transform_indices = @transform_2, window_bounds = array<i64: 24, 384>}, {pipeline_mode = #tpu.pipeline_mode<synchronous>, transform_indices = @transform_3, window_bounds = array<i64: 16, 384>}, {pipeline_mode = #tpu.pipeline_mode<synchronous>, transform_indices = @transform_4, window_bounds = array<i64: 16, 16>}, {pipeline_mode = #tpu.pipeline_mode<synchronous>, transform_indices = @transform_5, window_bounds = array<i64: 16, 24>}]} {
    %c0 = arith.constant 0 : index
    %c0_0 = arith.constant 0 : index
    %0 = vector.load %arg1[%c0, %c0_0] : memref<16x24xf32, #tpu.memory_space<vmem>>, vector<16x24xf32>
    %c0_1 = arith.constant 0 : index
    %c0_2 = arith.constant 0 : index
    %1 = vector.load %arg2[%c0_1, %c0_2] : memref<16x24xf32, #tpu.memory_space<vmem>>, vector<16x24xf32>
    %2 = arith.addf %0, %1 : vector<16x24xf32>
    %c0_3 = arith.constant 0 : index
    %c0_4 = arith.constant 0 : index
    %3 = vector.load %arg3[%c0_3, %c0_4] : memref<24x384xf32, #tpu.memory_space<vmem>>, vector<24x384xf32>
    %cst = arith.constant dense<0.000000e+00> : vector<16x384xf32>
    %4 = tpu.matmul %2, %3, %cst {dimension_numbers = #tpu.dot_dimension_numbers<[1], [0], [0], [1], [0, 0, 1, 1], [], []>} : vector<16x24xf32>, vector<24x384xf32>, vector<16x384xf32> -> vector<16x384xf32>
    %c0_5 = arith.constant 0 : index
    %c0_6 = arith.constant 0 : index
    %5 = vector.load %arg4[%c0_5, %c0_6] : memref<16x384xf32, #tpu.memory_space<vmem>>, vector<16x384xf32>
    %6 = arith.addf %4, %5 : vector<16x384xf32>
    %7 = vector.extract_strided_slice %6 {offsets = [0, 0], sizes = [16, 24], strides = [1, 1]} : vector<16x384xf32> to vector<16x24xf32>
    %8 = vector.extract_strided_slice %6 {offsets = [0, 128], sizes = [16, 24], strides = [1, 1]} : vector<16x384xf32> to vector<16x24xf32>
    %9 = vector.extract_strided_slice %6 {offsets = [0, 256], sizes = [16, 24], strides = [1, 1]} : vector<16x384xf32> to vector<16x24xf32>
    %cst_7 = arith.constant dense<0.000000e+00> : vector<16x16xf32>
    %10 = tpu.matmul %7, %8, %cst_7 {dimension_numbers = #tpu.dot_dimension_numbers<[1], [1], [0], [0], [0, 0, 1, 0], [], []>} : vector<16x24xf32>, vector<16x24xf32>, vector<16x16xf32> -> vector<16x16xf32>
    %c0_8 = arith.constant 0 : index
    %c0_9 = arith.constant 0 : index
    %11 = vector.load %arg5[%c0_8, %c0_9] : memref<16x16xf32, #tpu.memory_space<vmem>>, vector<16x16xf32>
    %12 = arith.addf %10, %11 : vector<16x16xf32>
    %cst_10 = arith.constant dense<0xFF800000> : vector<16xf32>
    %13 = vector.multi_reduction <maximumf>, %12, %cst_10 [1] : vector<16x16xf32> to vector<16xf32>
    %14 = vector.shape_cast %13 : vector<16xf32> to vector<16x1xf32>
    %15 = vector.broadcast %14 : vector<16x1xf32> to vector<16x16xf32>
    %16 = arith.subf %12, %15 : vector<16x16xf32>
    %17 = math.exp %16 : vector<16x16xf32>
    %cst_11 = arith.constant dense<0.000000e+00> : vector<16xf32>
    %18 = vector.multi_reduction <add>, %17, %cst_11 [1] : vector<16x16xf32> to vector<16xf32>
    %19 = vector.shape_cast %18 : vector<16xf32> to vector<16x1xf32>
    %20 = tpu.reciprocal %19 {approx = true} : vector<16x1xf32> -> vector<16x1xf32>
    %21 = arith.mulf %19, %20 : vector<16x1xf32>
    %cst_12 = arith.constant 2.000000e+00 : f32
    %22 = vector.broadcast %cst_12 : f32 to vector<16x1xf32>
    %23 = arith.subf %22, %21 : vector<16x1xf32>
    %24 = arith.mulf %20, %23 : vector<16x1xf32>
    %25 = vector.broadcast %24 : vector<16x1xf32> to vector<16x16xf32>
    %26 = arith.mulf %17, %25 : vector<16x16xf32>
    %cst_13 = arith.constant dense<0.000000e+00> : vector<16x24xf32>
    %27 = tpu.matmul %26, %9, %cst_13 {dimension_numbers = #tpu.dot_dimension_numbers<[1], [0], [0], [1], [0, 0, 1, 1], [], []>} : vector<16x16xf32>, vector<16x24xf32>, vector<16x24xf32> -> vector<16x24xf32>
    %28 = arith.addf %27, %2 : vector<16x24xf32>
    %c0_14 = arith.constant 0 : index
    %c0_15 = arith.constant 0 : index
    %29 = vector.load %arg6[%c0_14, %c0_15] : memref<16x24xf32, #tpu.memory_space<vmem>>, vector<16x24xf32>
    tpu.vector_store %arg6[%c0_14, %c0_15], %28 {strides = array<i32>} : memref<16x24xf32, #tpu.memory_space<vmem>>, vector<16x24xf32>,
    return
  }
  func.func @transform_0(%arg0: i32) -> (i32, i32) {
    %c0_i32 = arith.constant 0 : i32
    %c0_i32_0 = arith.constant 0 : i32
    %c0_i32_1 = arith.constant 0 : i32
    return %c0_i32, %c0_i32_0 : i32, i32
  }
  func.func @transform_1(%arg0: i32) -> (i32, i32) {
    %c0_i32 = arith.constant 0 : i32
    %c0_i32_0 = arith.constant 0 : i32
    %c0_i32_1 = arith.constant 0 : i32
    return %c0_i32, %c0_i32_0 : i32, i32
  }
  func.func @transform_2(%arg0: i32) -> (i32, i32) {
    %c0_i32 = arith.constant 0 : i32
    %c0_i32_0 = arith.constant 0 : i32
    %c0_i32_1 = arith.constant 0 : i32
    return %c0_i32, %c0_i32_0 : i32, i32
  }
  func.func @transform_3(%arg0: i32) -> (i32, i32) {
    %c0_i32 = arith.constant 0 : i32
    %c0_i32_0 = arith.constant 0 : i32
    %c0_i32_1 = arith.constant 0 : i32
    return %c0_i32, %c0_i32_0 : i32, i32
  }
  func.func @transform_4(%arg0: i32) -> (i32, i32) {
    %c0_i32 = arith.constant 0 : i32
    %c0_i32_0 = arith.constant 0 : i32
    %c0_i32_1 = arith.constant 0 : i32
    return %c0_i32, %c0_i32_0 : i32, i32
  }
  func.func @transform_5(%arg0: i32) -> (i32, i32) {
    %c0_i32 = arith.constant 0 : i32
    %c0_i32_0 = arith.constant 0 : i32
    %c0_i32_1 = arith.constant 0 : i32
    return %c0_i32, %c0_i32_0 : i32, i32
  }
}

</mosaic_0001>

<bundles_post_ra>
// kernel: tpu_custom_call.1
= control target key start
LH: loop header
LB: loop body
LE: loop exit
PB: predicated region body
PF: predicated region fallthrough
CT: control target
= control target key end

     0   :  { %10 = vsyncpa [#allocation3], 0  ;;  %s599_s0 = inlined_call_operand.hbm [shape: f32[16,24], index: 0, kind: input, shape index: {}]   ;;  %s600_s1 = inlined_call_operand.hbm [shape: f32[16,24], index: 1, kind: input, shape index: {}]   ;;  %s601_s2 = inlined_call_operand.hbm [shape: f32[24,384], index: 2, kind: input, shape index: {}]   ;;  %s602_s3 = inlined_call_operand.hbm [shape: f32[16,384], index: 3, kind: input, shape index: {}]   ;;  %s603_s4 = inlined_call_operand.hbm [shape: f32[16,16], index: 4, kind: input, shape index: {}]   ;;  %s604_s5 = inlined_call_operand.hbm [shape: f32[16,24], index: 5, kind: output, shape index: {}]  }
   0x1   :  { %11 = vsyncpa [#allocation6], 0 }
   0x2   :  { %12 = vsyncpa [#allocation9], 0 }
   0x3   :  { %13 = vsyncpa [#allocation4], 0  ;;  %s31_s20 = sshll.u32 %s600_s1, 4  ;;  %s499_s21 = smov [#allocation5]   ;;  %s32_s20 = int_to_ptr.hbm [resolvable:$true] %s31_s20 }
   0x4   :  { %s33_s22 = sshll.u32 %s499_s21, 4  ;;  %s500_s23 = smov 128   ;;  %s34_s22 = int_to_ptr.vmem [resolvable:$true] %s33_s22 }
   0x5   :  { %s501_s24 = smov 8   ;;  %s57_s27 = sshll.u32 %s602_s3, 4  ;;  %s58_s27 = int_to_ptr.hbm [resolvable:$true] %s57_s27 }
   0x6   :  { %39 = dma.hbm_to_vmem [thread:$0]  %s32_s20, 256, %s34_s22, [#allocation6], %s500_s23, %s500_s23, %s501_s24  }
   0x7   :  { %s502_s28 = smov [#allocation8]   ;;  %s18_s1 = sshll.u32 %s599_s0, 4  ;;  %s19_s1 = int_to_ptr.hbm [resolvable:$true] %s18_s1 }
   0x8   :  { %s59_s29 = sshll.u32 %s502_s28, 4  ;;  %s503_s7 = smov 384   ;;  %s60_s29 = int_to_ptr.vmem [resolvable:$true] %s59_s29 }
   0x9   :  { %s504_s8 = smov 24   ;;  %s44_s11 = sshll.u32 %s601_s2, 4  ;;  %s45_s11 = int_to_ptr.hbm [resolvable:$true] %s44_s11 }
   0xa   :  { %65 = dma.hbm_to_vmem [thread:$0]  %s58_s27, 768, %s60_s29, [#allocation9], %s503_s7, %s503_s7, %s504_s8  }
   0xb   :  { %s505_s12 = smov [#allocation2]   ;;  %s506_s3 = smov [#allocation7]  }
   0xc   :  { %s20_s13 = sshll.u32 %s505_s12, 4  ;;  %s46_s14 = sshll.u32 %s506_s3, 4  ;;  %s21_s13 = int_to_ptr.vmem [resolvable:$true] %s20_s13  ;;  %s47_s14 = int_to_ptr.vmem [resolvable:$true] %s46_s14 }
   0xd   :  { %26 = dma.hbm_to_vmem [thread:$0]  %s19_s1, 256, %s21_s13, [#allocation3], %s500_s23, %s500_s23, %s501_s24  }
   0xe   :  { %s70_s16 = sshll.u32 %s603_s4, 4  ;;  %s507_s17 = smov [#allocation10]   ;;  %s71_s16 = int_to_ptr.hbm [resolvable:$true] %s70_s16 }
   0xf   :  { %52 = dma.hbm_to_vmem [thread:$0]  %s45_s11, 1152, %s47_s14, [#allocation6], %s503_s7, %s503_s7, %s504_s8  }
  0x10   :  { %s72_s18 = sshll.u32 %s507_s17, 4  ;;  %s73_s18 = int_to_ptr.vmem [resolvable:$true] %s72_s18 }
  0x11   :  { %78 = dma.hbm_to_vmem [thread:$0]  %s71_s16, 256, %s73_s18, [#allocation9], %s500_s23, %s500_s23, %s501_s24  }
  0x12   :  { %491 = dma.done.wait [#allocation3], 256  }
  0x13   :  { %492 = vsyncadd [#allocation3], 4294967040 }
  0x14   :  { %493 = dma.done.wait [#allocation6], 1408  }
  0x15   :  { %494 = vsyncadd [#allocation6], 4294965888 }
  0x16   :  { %495 = dma.done.wait [#allocation9], 1024  }
  0x17   :  { %496 = vsyncadd [#allocation9], 4294966272  ;;  %v111_v0 = vld [vmem:[#allocation7 + $0x30] sm:$0xff]  ;;  %v108_v1 = vld [vmem:[#allocation7 + $0x18] sm:$0xff]  ;;  %vm120_vm0 = vcmask 195584   ;;  %vm233_vm1 = vcmask 130048  }
  0x18   :  { %326 = vmatpush.msra.mxu1 %v111_v0  ;;  %v100_v2 = vld [vmem:[#allocation2 + $0x8] sm:$0xff]  ;;  %v102_v3 = vld [vmem:[#allocation5 + $0x8] sm:$0xff]  ;;  %140 = vmatpush.msra.mxu0 %v111_v0  ;;  %v105_v4 = vld [vmem:[#allocation7] sm:$0xff]  ;;  %s508_s2 = smov [#allocation11]   ;;  %s299_s21 = sshll.u32 %s604_s5, 4  ;;  %s300_s21 = int_to_ptr.hbm [resolvable:$true] %s299_s21 }
  0x19   :  { %v563_v5 = vadd.f32 %v102_v3, %v100_v2  ;;  %v99_v6 = vld [vmem:[#allocation2] sm:$0xff]  ;;  %v101_v7 = vld [vmem:[#allocation5] sm:$0xff]  ;;  %v112_v8 = vld [vmem:[#allocation7 + $0x38] sm:$0xff]  ;;  %s297_s4 = sshll.u32 %s508_s2, 4  ;;  %s298_s4 = int_to_ptr.vmem [resolvable:$true] %s297_s4 }
  0x1a   :  { %327 = vmatpush.msra.mxu1 %v108_v1  ;;  %141 = vmatpush.msra.mxu0 %v108_v1  ;;  %v565_v9 = vadd.f32 %v101_v7, %v99_v6  ;;  %v109_v10 = vld [vmem:[#allocation7 + $0x20] sm:$0xff]  ;;  %v106_v11 = vld [vmem:[#allocation7 + $0x8] sm:$0xff]  ;;  %v115_v17 = vld [vmem:[#allocation8 + $0x8] sm:$0xff] }
  0x1b   :  { %v118_v14 = vld [vmem:[#allocation8 + $0x20] sm:$0xff]  ;;  %v117_v22 = vld [vmem:[#allocation8 + $0x18] sm:$0xff]  ;;  %v107_v26 = vld [vmem:[#allocation7 + $0x10] sm:$0xff] }
  0x1c   :  { %328 = vmatpush.msra.mxu1 %v105_v4  ;;  %142 = vmatpush.msra.mxu0 %v105_v4  ;;  %v114_v18 = vld [vmem:[#allocation8] sm:$0xff]  ;;  %v113_v24 = vld [vmem:[#allocation7 + $0x40] sm:$0xff]  ;;  %v196_v27 = vld [vmem:[#allocation10] sm:$0xff] }
  0x1d   :  { %315 = vmatmul.msk.f32.vlgmr.msra.gmra.mxu1 %vm120_vm0, %v563_v5  ;;  %314 = vmatmul.msk.f32.vlgmr.msra.gmra.mxu0 %vm120_vm0, %v565_v9  ;;  %v110_v25 = vld [vmem:[#allocation7 + $0x28] sm:$0xff]  ;;  %v197_v31 = vld [vmem:[#allocation10 + $0x8] sm:$0xff]  ;;  %v116_v39 = vld [vmem:[#allocation8 + $0x10] sm:$0xff] }
  0x1e   :  { %163 = vmatpush.msrb.mxu1 %v112_v8  ;;  %186 = vmatpush.msra.mxu2 %v113_v24  ;;  %v119_v40 = vld [vmem:[#allocation8 + $0x28] sm:$0xff] }
  0x20   :  { %164 = vmatpush.msrb.mxu1 %v109_v10  ;;  %187 = vmatpush.msra.mxu2 %v110_v25 }
  0x22   :  { %165 = vmatpush.msrb.mxu1 %v106_v11  ;;  %188 = vmatpush.msra.mxu2 %v107_v26 }
  0x23   :  { %318 = vmatmul.msk.f32.vlgmr.msra.gmra.mxu2 %vm120_vm0, %v565_v9 }
  0x25   :  { %316 = vmatmul.msk.f32.vlgmr.msrb.gmra.mxu1 %vm120_vm0, %v565_v9 }
  0x2b   :  { %319 = vmatmul.msk.f32.gmra.mxu2 %vm120_vm0, %v563_v5 }
  0x2d   :  { %317 = vmatmul.msk.f32.gmra.mxu1 %vm120_vm0, %v563_v5 }
  0x9a   :  { %v147_v12 = vpop.f32.mrf.mxu1  ;;  %v144_v19 = vpop.f32.mrf.mxu0 }
  0x9b   :  { %v145_v21 = vadd.f32 %v144_v19, %v114_v18  ;;  %v148_v23 = vadd.f32 %v147_v12, %v117_v22 }
  0xa2   :  { %v167_v13 = vpop.f32.mrf.mxu1 }
  0xa3   :  { %v168_v20 = vadd.f32 %v167_v13, %v115_v17 }
  0xa6   :  { %v190_v35 = vpop.f32.mrf.mxu2 }
  0xa7   :  { %v191_v42 = vadd.f32 %v190_v35, %v116_v39 }
  0xaa   :  { %v170_v15 = vpop.f32.mrf.mxu1 }
  0xab   :  { %v171_v16 = vadd.f32 %v170_v15, %v118_v14 }
  0xad   :  { %320 = vmatpush.xpose.msk.msra.mxu3 %vm120_vm0, %v171_v16 }
  0xae   :  { %v193_v41 = vpop.f32.mrf.mxu2 }
  0xaf   :  { %v194_v43 = vadd.f32 %v193_v41, %v119_v40 }
  0xb1   :  { %321 = vmatpush.xpose.msk.msra.mxu3 %vm120_vm0, %v168_v20  ;;  %282 = vmatpush.msrb.mxu0 %v194_v43 }
  0xb3   :  { %283 = vmatpush.msrb.mxu0 %v191_v42 }
  0xb4   :  { %322 = vmatmul.msk.f32.vlgmr.msra.gmra.mxu3 %vm120_vm0, %v145_v21 }
  0xbc   :  { %323 = vmatmul.msk.f32.gmra.mxu3 %vm120_vm0, %v148_v23 }
 0x137   :  { %v227_v28 = vpop.f32.mrf.mxu3 }
 0x138   :  { %v228_v29 = vadd.f32 %v227_v28, %v196_v27 }
 0x13a   :  { %v234_v30 = vsel %vm233_vm1, %v228_v29, -inf }
 0x13b   :  { %235 = vmax.xlane.f32.xlu0 %v234_v30 }
 0x13f   :  { %v230_v32 = vpop.f32.mrf.mxu3 }
 0x140   :  { %v231_v33 = vadd.f32 %v230_v32, %v197_v31 }
 0x142   :  { %v237_v34 = vsel %vm233_vm1, %v231_v33, -inf }
 0x143   :  { %238 = vmax.xlane.f32.xlu0 %v237_v34 }
 0x1ae   :  { %v236_v36 = vpop.xlane.xlu0 %235 }
 0x1af   :  { %v240_v37 = vsub.f32 %v228_v29, %v236_v36 }
 0x1b1   :  { %v242_v38 = vmul.f32 1.442695, %v240_v37 }
 0x1b3   :  { %339 = vpow2.f32 %v242_v38 }
 0x1b6   :  { %v239_v44 = vpop.xlane.xlu0 %238 }
 0x1b7   :  { %v241_v45 = vsub.f32 %v231_v33, %v239_v44 }
 0x1b9   :  { %v340_v46 = vpop.eup %339  ;;  %v244_v47 = vmul.f32 1.442695, %v241_v45 }
 0x1ba   :  { %v246_v48 = vsel %vm233_vm1, %v340_v46, 0.0 }
 0x1bb   :  { %341 = vpow2.f32 %v244_v47  ;;  %247 = vadd.xlane.f32.xlu1 %v246_v48 }
 0x1c1   :  { %v342_v49 = vpop.eup %341 }
 0x1c2   :  { %v249_v50 = vsel %vm233_vm1, %v342_v49, 0.0 }
 0x1c3   :  { %250 = vadd.xlane.f32.xlu1 %v249_v50 }
 0x22e   :  { %v248_v51 = vpop.xlane.xlu1 %247 }
 0x22f   :  { %343 = vrcp.f32 %v248_v51 }
 0x235   :  { %v344_v52 = vpop.eup %343 }
 0x236   :  { %v254_v53 = vmul.f32 %v344_v52, %v248_v51  ;;  %v251_v54 = vpop.xlane.xlu1 %250 }
 0x237   :  { %345 = vrcp.f32 %v251_v54 }
 0x238   :  { %v256_v55 = vsub.f32 2.0, %v254_v53 }
 0x23a   :  { %v258_v56 = vmul.f32 %v344_v52, %v256_v55 }
 0x23c   :  { %v260_v57 = vmul.f32 %v340_v46, %v258_v56 }
 0x23d   :  { %v346_v58 = vpop.eup %345 }
 0x23e   :  { %v255_v59 = vmul.f32 %v346_v58, %v251_v54  ;;  %324 = vmatmul.msk.f32.vlgmr.msrb.gmra.mxu0 %vm233_vm1, %v260_v57 }
 0x240   :  { %v257_v60 = vsub.f32 2.0, %v255_v59 }
 0x242   :  { %v259_v61 = vmul.f32 %v346_v58, %v257_v60 }
 0x244   :  { %v261_v62 = vmul.f32 %v342_v49, %v259_v61 }
 0x246   :  { %325 = vmatmul.msk.f32.gmra.mxu0 %vm233_vm1, %v261_v62 }
 0x2bb   :  { %v285_v63 = vpop.f32.mrf.mxu0 }
 0x2bc   :  { %v286_v0 = vadd.f32 %v285_v63, %v565_v9 }
 0x2be   :  { %291 = vst.msk [vmem:[#allocation11] sm:$0xff] %vm120_vm0, %v286_v0 }
 0x2c3   :  { %v288_v1 = vpop.f32.mrf.mxu0 }
 0x2c4   :  { %v289_v2 = vadd.f32 %v288_v1, %v563_v5 }
 0x2c6   :  { %292 = vst.msk [vmem:[#allocation11 + $0x8] sm:$0xff] %vm120_vm0, %v289_v2 }
 0x2c7   :  { %305 = dma.vmem_to_hbm [thread:$0]  %s298_s4, 256, %s300_s21, [#allocation4], %s500_s23, %s500_s23, %s501_s24  }
 0x2c8   :  { %497 = dma.done.wait [#allocation4], 256  }
 0x2c9   :  { %498 = vsyncadd [#allocation4], 4294967040 }
 0x2ca   :  { %310 = vsyncpa [#allocation3], 1 }
 0x2cb   :  { %311 = vsyncpa [#allocation6], 1 }
 0x2cc   :  { %312 = vsyncpa [#allocation9], 1 }
 0x2cd   :  { %313 = vsyncpa [#allocation4], 1 }

</bundles_post_ra>
